<compile_context>
chip_gen: v7x
topology: tpu7x:2x2x1
jax: 0.10.0
libtpu: 0.0.40
codegen_flags: <defaults>
</compile_context>

<pallas_src>
import math
from functools import partial

import jax
import jax.numpy as jnp
from jax.experimental import pallas as pl
from jax.experimental.pallas import tpu as pltpu


def _round_up(x, m):
    return ((x + m - 1) // m) * m


def _patch_proj_kernel(p_ref, w_ref, b_ref, o_ref):
    # p_ref: (tile_m, K) bf16   -- streamed patch tile
    # w_ref: (K, E_pad) bf16    -- VMEM-resident (constant index_map)
    # b_ref: (1, E_pad) f32     -- VMEM-resident
    # o_ref: (tile_m, E_pad)    -- lane-dense output tile
    acc = jnp.dot(p_ref[...], w_ref[...], preferred_element_type=jnp.float32)
    o_ref[...] = (acc + b_ref[...]).astype(o_ref.dtype)


def _choose_tile_m(m16, k, e_pad, out_bytes, vmem_budget):
    """Largest 256/16-aligned M tile whose VMEM working set fits the budget."""
    def need(t):
        return (2 * t * k * 2               # double-buffered bf16 patch tiles
                + 2 * k * e_pad * 2         # weight (resident; Pallas still
                                            #   allocates 2 buffers, no re-DMA)
                + 2 * e_pad * 4             # bias
                + 2 * t * e_pad * out_bytes # double-buffered output tiles
                + t * e_pad * 4)            # in-kernel f32 accumulator
    # Cap so large problems get >= 2 grid steps (both v7x TensorCores busy).
    cap = m16 if m16 <= 256 else max(256, _round_up((m16 + 1) // 2, 256))
    for t in (1024, 512, 256, 128, 64, 32, 16):
        if t <= cap and need(t) <= vmem_budget:
            return t, need(t)
    # NOTE: if even tile_m=16 overflows the budget, K/E would need tiling too
    # (not required for standard ViT patch-embed shapes).
    return 16, need(16)


def patch_embed_pallas(x, weight, bias, patch_size, *,
                       compute_dtype=jnp.bfloat16, out_dtype=None,
                       vmem_budget_bytes=28 << 20):
    """PatchEmbed forward (PyTorch Conv2d(k=s=p) + 'b c h w -> b (h w) c').

    x:       (B, C, H, W)  NCHW, like PyTorch.
    weight:  (E, C, p, p)  conv weight (OIHW).
    bias:    (E,)
    out_dtype: output dtype (default: x.dtype).  Pass jnp.bfloat16 to halve the
               output HBM write on mem-bound v6e/v7x; accumulation stays f32.
    Returns (B, (H//p)*(W//p), E).
    """
    B, C, H, W = x.shape
    E = weight.shape[0]
    p = patch_size
    assert H % p == 0 and W % p == 0, "H and W must be divisible by patch_size"
    Hp, Wp = H // p, W // p
    N = Hp * Wp
    M = B * N
    K = C * p * p
    out_dtype = x.dtype if out_dtype is None else out_dtype
    out_bytes = jnp.dtype(out_dtype).itemsize

    # Lane padding only when E is not already 128-aligned (toy E=32); real ViT
    # widths (768/1024/1280) take the no-pad, no-slice path.
    E_pad = E if E % 128 == 0 else _round_up(E, 128)
    # 16-row alignment for bf16 sublane packing (min bf16 tile is (16, 128)).
    M16 = _round_up(M, 16)

    tile_m, vmem_need = _choose_tile_m(M16, K, E_pad, out_bytes, vmem_budget_bytes)
    tile_m = min(tile_m, M16)
    grid_m = (M16 + tile_m - 1) // tile_m   # last block may be partial; no whole-tile M pad

    # ---- patchify (wrapper-side; see TODO at top): cast -> transpose -> pad is
    # a single fusible producer chain, so x is read once (f32) and the bf16
    # patch matrix written once.  Flattening order (c, kh, kw) matches the
    # PyTorch conv-weight flattening.
    xq = x.astype(compute_dtype)
    xq = xq.reshape(B, C, Hp, p, Wp, p)
    xq = jnp.transpose(xq, (0, 2, 4, 1, 3, 5))          # (B, Hp, Wp, C, p, p)
    patches = xq.reshape(M, K)
    if M16 != M:
        patches = jnp.pad(patches, ((0, M16 - M), (0, 0)))

    w_t = jnp.transpose(weight.reshape(E, K).astype(compute_dtype))   # (K, E)
    if E_pad != E:
        w_t = jnp.pad(w_t, ((0, 0), (0, E_pad - E)))
    b_row = bias.astype(jnp.float32).reshape(1, E)
    if E_pad != E:
        b_row = jnp.pad(b_row, ((0, 0), (0, E_pad - E)))

    cost = pl.CostEstimate(
        flops=2 * M16 * K * E_pad,
        transcendentals=0,
        bytes_accessed=(M16 * K * 2 + K * E_pad * 2 + E_pad * 4
                        + M16 * E_pad * out_bytes),
    )

    out = pl.pallas_call(
        _patch_proj_kernel,
        out_shape=jax.ShapeDtypeStruct((M16, E_pad), out_dtype),
        grid_spec=pltpu.PrefetchScalarGridSpec(
            num_scalar_prefetch=0,
            grid=(grid_m,),
            in_specs=[
                pl.BlockSpec((tile_m, K), lambda i: (i, 0)),     # streamed M tiles
                pl.BlockSpec((K, E_pad), lambda i: (0, 0)),      # weight: VMEM-resident
                pl.BlockSpec((1, E_pad), lambda i: (0, 0)),      # bias:   VMEM-resident
            ],
            out_specs=pl.BlockSpec((tile_m, E_pad), lambda i: (i, 0)),
        ),
        compiler_params=pltpu.CompilerParams(
            # Independent M tiles: shard across both TensorCores on v7x;
            # harmless on single-TC v5e/v6e.
            dimension_semantics=("parallel",),
            # Explicit VMEM sizing (v7x: 64 MiB physical / 32 MiB scoped
            # default; v5e: 16 MiB scoped default).
            vmem_limit_bytes=int(min(56 << 20, max(vmem_need + (4 << 20), 16 << 20))),
        ),
        cost_estimate=cost,
    )(patches, w_t, b_row)

    if M16 != M:
        out = out[:M]
    if E_pad != E:
        out = out[:, :E]
    return out.reshape(B, N, E)


if __name__ == "__main__":
    # Small config consistent with the module: patch_size=8, in_channels=4,
    # embed_dim=32, 16x16 images, batch=2.
    B, C, H, W = 2, 4, 16, 16
    patch_size = 8
    embed_dim = 32

    key = jax.random.PRNGKey(0)
    kx, kw, kb = jax.random.split(key, 3)

    x = jax.random.normal(kx, (B, C, H, W), dtype=jnp.float32)

    # Deterministic Conv2d-style init (kaiming-uniform bounds).
    fan_in = C * patch_size * patch_size
    bound = 1.0 / math.sqrt(fan_in)
    weight = jax.random.uniform(kw, (embed_dim, C, patch_size, patch_size),
                                minval=-bound, maxval=bound, dtype=jnp.float32)
    bias = jax.random.uniform(kb, (embed_dim,), minval=-bound, maxval=bound,
                              dtype=jnp.float32)

    fwd = jax.jit(partial(patch_embed_pallas, patch_size=patch_size))
    out = jax.block_until_ready(fwd(x, weight, bias))

    Np = (H // patch_size) * (W // patch_size)
    assert out.shape == (B, Np, embed_dim)
    assert out.dtype == x.dtype

    # Reference 1: same bf16 operand quantization + f32 accumulation as the
    # kernel (tight tolerance).
    ref_bf16 = jax.lax.conv_general_dilated(
        x.astype(jnp.bfloat16), weight.astype(jnp.bfloat16),
        window_strides=(patch_size, patch_size), padding="VALID",
        dimension_numbers=("NCHW", "OIHW", "NCHW"),
        preferred_element_type=jnp.float32,
    ) + bias.reshape(1, embed_dim, 1, 1)
    ref_bf16 = jnp.transpose(ref_bf16.reshape(B, embed_dim, -1), (0, 2, 1))
    assert jnp.allclose(out.astype(jnp.float32), ref_bf16, atol=2e-3, rtol=2e-3)

    # Reference 2: full-f32 PyTorch Conv2d semantics (loose tolerance; the only
    # difference is the deliberate bf16 cast of the MXU operands).
    ref_f32 = jax.lax.conv_general_dilated(
        x, weight, window_strides=(patch_size, patch_size), padding="VALID",
        dimension_numbers=("NCHW", "OIHW", "NCHW"),
    ) + bias.reshape(1, embed_dim, 1, 1)
    ref_f32 = jnp.transpose(ref_f32.reshape(B, embed_dim, -1), (0, 2, 1))
    assert jnp.allclose(out, ref_f32, atol=5e-2, rtol=5e-2)

    print("KERNEL_OK")
</pallas_src>

<mosaic_0001>
module attributes {stable_mosaic.version = 11 : i64} {
  func.func @_patch_proj_kernel(%arg0: i32, %arg1: memref<16x256xbf16, #tpu.memory_space<vmem>>, %arg2: memref<256x128xbf16, #tpu.memory_space<vmem>>, %arg3: memref<1x128xf32, #tpu.memory_space<vmem>>, %arg4: memref<16x128xf32, #tpu.memory_space<vmem>>) attributes {dimension_semantics = [#tpu.dimension_semantics<parallel>], iteration_bounds = array<i64: 1>, scalar_prefetch = 0 : i64, scratch_operands = 0 : i64, tpu.core_type = #tpu.core_type<tc>, window_params = [{transform_indices = @transform_0, window_bounds = array<i64: 16, 256>}, {pipeline_mode = #tpu.pipeline_mode<synchronous>, transform_indices = @transform_1, window_bounds = array<i64: 256, 128>}, {pipeline_mode = #tpu.pipeline_mode<synchronous>, transform_indices = @transform_2, window_bounds = array<i64: 1, 128>}, {transform_indices = @transform_3, window_bounds = array<i64: 16, 128>}]} {
    %c0 = arith.constant 0 : index
    %c0_0 = arith.constant 0 : index
    %0 = vector.load %arg1[%c0, %c0_0] : memref<16x256xbf16, #tpu.memory_space<vmem>>, vector<16x256xbf16>
    %c0_1 = arith.constant 0 : index
    %c0_2 = arith.constant 0 : index
    %1 = vector.load %arg2[%c0_1, %c0_2] : memref<256x128xbf16, #tpu.memory_space<vmem>>, vector<256x128xbf16>
    %cst = arith.constant dense<0.000000e+00> : vector<16x128xf32>
    %2 = tpu.matmul %0, %1, %cst {dimension_numbers = #tpu.dot_dimension_numbers<[1], [0], [0], [1], [0, 0, 1, 1], [], []>} : vector<16x256xbf16>, vector<256x128xbf16>, vector<16x128xf32> -> vector<16x128xf32>
    %c0_3 = arith.constant 0 : index
    %c0_4 = arith.constant 0 : index
    %3 = vector.load %arg3[%c0_3, %c0_4] : memref<1x128xf32, #tpu.memory_space<vmem>>, vector<1x128xf32>
    %4 = vector.broadcast %3 : vector<1x128xf32> to vector<16x128xf32>
    %5 = arith.addf %2, %4 : vector<16x128xf32>
    %c0_5 = arith.constant 0 : index
    %c0_6 = arith.constant 0 : index
    %6 = vector.load %arg4[%c0_5, %c0_6] : memref<16x128xf32, #tpu.memory_space<vmem>>, vector<16x128xf32>
    tpu.vector_store %arg4[%c0_5, %c0_6], %5 {strides = array<i32>} : memref<16x128xf32, #tpu.memory_space<vmem>>, vector<16x128xf32>,
    return
  }
  func.func @transform_0(%arg0: i32) -> (i32, i32) {
    %c0_i32 = arith.constant 0 : i32
    %c0_i32_0 = arith.constant 0 : i32
    return %arg0, %c0_i32 : i32, i32
  }
  func.func @transform_1(%arg0: i32) -> (i32, i32) {
    %c0_i32 = arith.constant 0 : i32
    %c0_i32_0 = arith.constant 0 : i32
    %c0_i32_1 = arith.constant 0 : i32
    return %c0_i32, %c0_i32_0 : i32, i32
  }
  func.func @transform_2(%arg0: i32) -> (i32, i32) {
    %c0_i32 = arith.constant 0 : i32
    %c0_i32_0 = arith.constant 0 : i32
    %c0_i32_1 = arith.constant 0 : i32
    return %c0_i32, %c0_i32_0 : i32, i32
  }
  func.func @transform_3(%arg0: i32) -> (i32, i32) {
    %c0_i32 = arith.constant 0 : i32
    %c0_i32_0 = arith.constant 0 : i32
    return %arg0, %c0_i32 : i32, i32
  }
}

</mosaic_0001>

<bundles_post_ra>
// kernel: patch_embed_pallas.1
= control target key start
LH: loop header
LB: loop body
LE: loop exit
PB: predicated region body
PF: predicated region fallthrough
CT: control target
= control target key end

     0   :  { %s352_s1 = inlined_call_operand.vmem [shape: bf16[256,128], index: 1, kind: input, shape index: {}]   ;;  %s353_s0 = inlined_call_operand.vmem [shape: bf16[16,256], index: 0, kind: input, shape index: {}]   ;;  %s354_s2 = inlined_call_operand.vmem [shape: f32[1,128], index: 2, kind: input, shape index: {}]   ;;  %s355_s3 = inlined_call_operand.vmem [shape: f32[16,128], index: 3, kind: output, shape index: {}]  }
   0x1   :  { %v250_v0 = vld [vmem:[%s352_s1 + $0x40] sm:$0xff]   ;;  %v252_v2 = vld [vmem:[%s352_s1 + $0x48] sm:$0xff]   ;;  %v254_v4 = vld [vmem:[%s352_s1 + $0x50] sm:$0xff]  }
   0x2   :  { %v251_v1 = vld [vmem:[%s352_s1] sm:$0xff]   ;;  %228 = vmatprep.subr.bf16.mxu0 %v250_v0  ;;  %v253_v3 = vld [vmem:[%s352_s1 + $0x8] sm:$0xff]   ;;  %v255_v5 = vld [vmem:[%s352_s1 + $0x10] sm:$0xff]  }
   0x3   :  { %229 = vmatpush3.bf16.msra.mxu0 %v251_v1  ;;  %v256_v6 = vld [vmem:[%s352_s1 + $0x58] sm:$0xff]   ;;  %v258_v8 = vld [vmem:[%s352_s1 + $0x60] sm:$0xff]   ;;  %v260_v10 = vld [vmem:[%s352_s1 + $0x68] sm:$0xff]  }
   0x4   :  { %230 = vmatprep.subr.bf16.mxu0 %v252_v2  ;;  %v257_v7 = vld [vmem:[%s352_s1 + $0x18] sm:$0xff]   ;;  %v259_v9 = vld [vmem:[%s352_s1 + $0x20] sm:$0xff]   ;;  %v261_v12 = vld [vmem:[%s352_s1 + $0x28] sm:$0xff]  }
   0x5   :  { %v268_v11 = vld [vmem:[%s353_s0 + $0x4] ss:$8 sps:$4 sm:$0xff]   ;;  %v262_v13 = vld [vmem:[%s352_s1 + $0x70] sm:$0xff]   ;;  %v264_v15 = vld [vmem:[%s352_s1 + $0x78] sm:$0xff]  }
   0x6   :  { %194 = vmatprep.mubr.bf16.mxu0 %v268_v11  ;;  %v263_v14 = vld [vmem:[%s352_s1 + $0x30] sm:$0xff]   ;;  %v265_v16 = vld [vmem:[%s352_s1 + $0x38] sm:$0xff]   ;;  %v266_v17 = vld [vmem:[%s353_s0] ss:$8 sps:$4 sm:$0xff]  }
   0x7   :  { %231 = vmatpush3.bf16.msra.mxu0 %v253_v3  ;;  %v209_v19 = vld [vmem:[%s354_s2] ss:$0 sm:$0xff] }
   0x8   :  { %232 = vmatprep.subr.bf16.mxu0 %v254_v4 }
   0xb   :  { %233 = vmatpush3.bf16.msra.mxu0 %v255_v5 }
   0xc   :  { %234 = vmatprep.subr.bf16.mxu0 %v256_v6 }
   0xf   :  { %235 = vmatpush3.bf16.msra.mxu0 %v257_v7 }
  0x10   :  { %236 = vmatprep.subr.bf16.mxu0 %v258_v8 }
  0x13   :  { %237 = vmatpush3.bf16.msra.mxu0 %v259_v9 }
  0x14   :  { %238 = vmatprep.subr.bf16.mxu0 %v260_v10 }
  0x17   :  { %239 = vmatpush3.bf16.msra.mxu0 %v261_v12 }
  0x18   :  { %240 = vmatprep.subr.bf16.mxu0 %v262_v13 }
  0x1b   :  { %241 = vmatpush3.bf16.msra.mxu0 %v263_v14 }
  0x1c   :  { %242 = vmatprep.subr.bf16.mxu0 %v264_v15 }
  0x1f   :  { %243 = vmatpush3.bf16.msra.mxu0 %v265_v16 }
  0x22   :  { %195 = vmatmul.mubr.bf16.vlgmr.msra.gmra.mrb[0].mxu0 %v266_v17 }
  0xf5   :  { %v244_v18 = vpop.f32.mrb[0].mxu0 }
  0xf6   :  { %v245_v20 = vpop.f32.mrb[1].mxu0 }
  0xf7   :  { %v246_v21 = vadd.f32 %v245_v20, %v244_v18  ;;  %v247_v22 = vpop.f32.mrb[2].mxu0 }
  0xf8   :  { %v248_v23 = vpop.f32.mrb[3].mxu0 }
  0xf9   :  { %v197_v24 = vadd.f32 %v246_v21, %v209_v19  ;;  %v249_v25 = vadd.f32 %v248_v23, %v247_v22 }
  0xfb   :  { %203 = vst [vmem:[%s355_s3] sm:$0xff] %v197_v24  ;;  %v200_v26 = vadd.f32 %v249_v25, %v209_v19 }
  0xfd   :  { %204 = vst [vmem:[%s355_s3 + $0x8] sm:$0xff] %v200_v26 }

</bundles_post_ra>
